<compile_context>
chip_gen: v5e
topology: v5e:2x2
jax: 0.10.0
libtpu: 0.0.40
codegen_flags: <defaults>
</compile_context>

<pallas_src>
import functools

import jax
import jax.numpy as jnp
from jax.experimental import pallas as pl
from jax.experimental.pallas import tpu as pltpu


def _dwsep_kernel(*refs, K, padding, W, L_in, use_sel):
    """One batch-group (G packed images) per grid step.

    refs (in order):
      x_ref:    (1, G*C, L_in)        packed channel-major input, spatial on lanes
      wm_ref:   (K*K, G*C, L_in)      pre-folded depthwise weight * boundary mask
      sel_ref:  (L_in, L_out)         [only if use_sel] 0/1 anchor-selection matrix
      pw_w_ref: (G*C_out, G*C)        block-diagonal pointwise weights
      pw_b_ref: (G*C_out, 1)          pointwise bias (depthwise bias folded in)
      o_ref:    (1, G*C_out, L_out)
    """
    if use_sel:
        x_ref, wm_ref, sel_ref, pw_w_ref, pw_b_ref, o_ref = refs
    else:
        x_ref, wm_ref, pw_w_ref, pw_b_ref, o_ref = refs
        sel_ref = None

    x = x_ref[0].astype(jnp.float32)          # (G*C, L_in): full 8-sublane occupancy
    acc = jnp.zeros_like(x)

    # Depthwise conv: each tap = lane rotation (XLU slot) + a single FMA against the
    # pre-folded weight-mask (VPU slot). Static unroll over the K*K taps.
    # NOTE: wm * rolled propagates NaN through masked-out (wm == 0) boundary lanes;
    # inputs are assumed finite (use jnp.where(wm != 0, ...) otherwise).
    for di in range(K):
        for dj in range(K):
            t = di * K + dj
            s_flat = (di - padding) * W + (dj - padding)     # flattened tap offset
            shift = (-s_flat) % L_in                         # rolled[q] == x[(q + s_flat) mod L]
            rolled = pltpu.roll(x, shift, axis=1) if shift else x
            acc = acc + wm_ref[t] * rolled

    # stride>1 / non-"same" output sizes: 0/1 anchor-selection matmul on the otherwise
    # idle MXU slot (replaces the old in-kernel reshape + strided-slice relayout).
    if sel_ref is not None:
        acc = jnp.dot(acc, sel_ref[...], preferred_element_type=jnp.float32)

    # Pointwise 1x1 conv over ALL packed images at once via a block-diagonal weight:
    # (G*C_out, G*C) @ (G*C, L_out). Result has G*C_out on sublanes, L_out on lanes
    # -> lane-dense output store (unmasked for the stride-1 "same" case, L_out = 256).
    y = jnp.dot(pw_w_ref[...], acc, preferred_element_type=jnp.float32)
    y = y + pw_b_ref[...]
    o_ref[0] = y.astype(o_ref.dtype)


def depthwise_separable_conv(x_nchw, dw_weight, dw_bias, pw_weight, pw_bias,
                             *, stride=1, padding=1):
    """Matches DepthwiseSeparableConv.forward on NCHW input.

    dw_weight: (C, 1, K, K)   (torch Conv2d groups=C layout)
    dw_bias:   (C,)
    pw_weight: (Cout, C, 1, 1)
    pw_bias:   (Cout,)
    """
    N, C, H, W = x_nchw.shape
    K = dw_weight.shape[-1]
    C_out = pw_weight.shape[0]
    H_out = (H + 2 * padding - K) // stride + 1
    W_out = (W + 2 * padding - K) // stride + 1

    if 2 * padding > K - 1:
        # TODO(synk): padding > (K-1)//2 needs explicit halo/pad handling; the
        # flattened-anchor (roll + mask) formulation covers 2*padding <= K-1 only.
        raise NotImplementedError("depthwise_separable_conv requires 2*padding <= K-1")

    L_in = H * W
    L_out = H_out * W_out
    use_sel = (stride, H_out, W_out) != (1, H, W)

    # Pack G images into the sublane axis so the 8-sublane f32 vreg is full even for
    # tiny C; remaining batch groups form a "parallel" grid axis (v7x dual-TC sharding).
    G = min(max(1, 8 // C), N)
    NG = -(-N // G)
    N_pad = NG * G
    if N_pad != N:
        x_nchw = jnp.concatenate(
            [x_nchw, jnp.zeros((N_pad - N, C, H, W), x_nchw.dtype)], axis=0)

    GC = G * C
    GCo = G * C_out

    # Free (metadata-only) reshapes; input stays channel-major -- no transpose, no
    # padded HBM copy (boundaries handled by the folded validity masks below).
    x_packed = x_nchw.reshape(N_pad, C, L_in).reshape(NG, GC, L_in)

    # Per-tap boundary-validity masks over the flattened (i, j) anchor grid, pre-folded
    # with the depthwise weights -> one FMA per tap inside the kernel.
    rows = jnp.arange(H)[:, None]
    cols = jnp.arange(W)[None, :]
    mask_list = []
    for di in range(K):
        for dj in range(K):
            m = ((rows + di - padding >= 0) & (rows + di - padding < H) &
                 (cols + dj - padding >= 0) & (cols + dj - padding < W))
            mask_list.append(m.reshape(L_in))
    mask = jnp.stack(mask_list, axis=0).astype(jnp.float32)          # (K*K, L_in)
    dw_taps = jnp.transpose(dw_weight.reshape(C, K * K), (1, 0))     # (K*K, C)
    dw_taps_g = jnp.tile(dw_taps, (1, G))                            # (K*K, G*C)
    # Kept f32 (not bf16) so the folded weights stay exact and v5e (no bf16 VPU) is unaffected.
    wm = dw_taps_g[:, :, None].astype(jnp.float32) * mask[:, None, :]  # (K*K, G*C, L_in)

    # Block-diagonal pointwise weight over the G packed images; fold the depthwise bias:
    # pw(dw(x) + b_dw) = Wp.dw(x) + (Wp.b_dw + b_pw)  (exact f32 elementwise mul + sum).
    pw_w_t = pw_weight[:, :, 0, 0].astype(jnp.float32)               # (C_out, C)
    pw_w_bd = jnp.kron(jnp.eye(G, dtype=jnp.float32), pw_w_t)        # (G*C_out, G*C)
    pw_b_eff = pw_bias + jnp.sum(pw_w_t * dw_bias[None, :], axis=1)  # (C_out,)
    pw_b_bd = jnp.tile(pw_b_eff, G).reshape(GCo, 1)                  # (G*C_out, 1)

    operands = [x_packed, wm]
    in_specs = [
        pl.BlockSpec((1, GC, L_in), lambda b: (b, 0, 0)),
        # Constant-index operand; stays VMEM-resident (tiny: K*K*G*C*L_in*4 bytes).
        pl.BlockSpec((K * K, GC, L_in), lambda b: (0, 0, 0)),
    ]
    if use_sel:
        # 0/1 anchor-selection matrix: sel[(io*stride)*W + jo*stride, io*W_out + jo] = 1.
        sel_rows = ((jnp.arange(H_out) * stride)[:, None] * W +
                    (jnp.arange(W_out) * stride)[None, :]).reshape(L_out)
        sel = (jnp.arange(L_in)[:, None] == sel_rows[None, :]).astype(jnp.float32)
        operands.append(sel)
        in_specs.append(pl.BlockSpec((L_in, L_out), lambda b: (0, 0)))
        # TODO(synk): for L_out < 128 the output store is a masked vst; packing several
        # groups' outputs onto the lane axis would make it lane-dense.
    operands += [pw_w_bd, pw_b_bd]
    in_specs += [
        pl.BlockSpec((GCo, GC), lambda b: (0, 0)),
        pl.BlockSpec((GCo, 1), lambda b: (0, 0)),
    ]

    kernel = functools.partial(_dwsep_kernel, K=K, padding=padding, W=W,
                               L_in=L_in, use_sel=use_sel)

    out_packed = pl.pallas_call(
        kernel,
        out_shape=jax.ShapeDtypeStruct((NG, GCo, L_out), x_nchw.dtype),
        grid_spec=pltpu.PrefetchScalarGridSpec(
            num_scalar_prefetch=0,
            grid=(NG,),
            in_specs=in_specs,
            out_specs=pl.BlockSpec((1, GCo, L_out), lambda b: (b, 0, 0)),
        ),
        compiler_params=pltpu.CompilerParams(dimension_semantics=("parallel",)),
    )(*operands)

    # Free reshape back to NCHW (row order is (group, image-in-group, C_out)).
    out = out_packed.reshape(N_pad, C_out, H_out, W_out)
    return out[:N]


def _reference(x_nchw, dw_weight, dw_bias, pw_weight, pw_bias, *, stride=1, padding=1):
    """Pure-JAX reference via lax.conv_general_dilated (NCHW, OIHW)."""
    C = x_nchw.shape[1]
    dw = jax.lax.conv_general_dilated(
        x_nchw, dw_weight, window_strides=(stride, stride),
        padding=((padding, padding), (padding, padding)),
        feature_group_count=C,
        dimension_numbers=("NCHW", "OIHW", "NCHW"))
    dw = dw + dw_bias[None, :, None, None]
    pw = jax.lax.conv_general_dilated(
        dw, pw_weight, window_strides=(1, 1), padding="VALID",
        dimension_numbers=("NCHW", "OIHW", "NCHW"))
    return pw + pw_bias[None, :, None, None]


if __name__ == "__main__":
    # Small shapes consistent with the module: N=2, C_in=4, C_out=8, K=3, H=W=16.
    N, C_in, C_out, K, H, W = 2, 4, 8, 3, 16, 16

    key = jax.random.PRNGKey(0)
    kx, k1, k2, k3, k4 = jax.random.split(key, 5)

    x = jax.random.normal(kx, (N, C_in, H, W), dtype=jnp.float32)
    dw_weight = jax.random.normal(k1, (C_in, 1, K, K), dtype=jnp.float32) * 0.1
    dw_bias = jax.random.normal(k2, (C_in,), dtype=jnp.float32) * 0.1
    pw_weight = jax.random.normal(k3, (C_out, C_in, 1, 1), dtype=jnp.float32) * 0.1
    pw_bias = jax.random.normal(k4, (C_out,), dtype=jnp.float32) * 0.1

    # Module defaults: stride=1, padding=1 ("same" output).
    out = depthwise_separable_conv(x, dw_weight, dw_bias, pw_weight, pw_bias,
                                   stride=1, padding=1)
    out = jax.block_until_ready(out)
    ref = _reference(x, dw_weight, dw_bias, pw_weight, pw_bias, stride=1, padding=1)
    assert out.shape == (N, C_out, H, W), out.shape
    assert jnp.allclose(out, ref, atol=1e-4, rtol=1e-4), "stride-1 mismatch vs reference"

    # stride=2 path (selection-matrix branch), validated per review feedback.
    out2 = depthwise_separable_conv(x, dw_weight, dw_bias, pw_weight, pw_bias,
                                    stride=2, padding=1)
    out2 = jax.block_until_ready(out2)
    ref2 = _reference(x, dw_weight, dw_bias, pw_weight, pw_bias, stride=2, padding=1)
    assert out2.shape == ref2.shape, (out2.shape, ref2.shape)
    assert jnp.allclose(out2, ref2, atol=1e-4, rtol=1e-4), "stride-2 mismatch vs reference"

    print("KERNEL_OK")
</pallas_src>

<mosaic_0001>
module attributes {stable_mosaic.version = 11 : i64} {
  func.func @_dwsep_kernel(%arg0: i32, %arg1: memref<1x8x256xf32, #tpu.memory_space<vmem>>, %arg2: memref<9x8x256xf32, #tpu.memory_space<vmem>>, %arg3: memref<16x8xf32, #tpu.memory_space<vmem>>, %arg4: memref<16x1xf32, #tpu.memory_space<vmem>>, %arg5: memref<1x16x256xf32, #tpu.memory_space<vmem>>) attributes {dimension_semantics = [#tpu.dimension_semantics<parallel>], iteration_bounds = array<i64: 1>, scalar_prefetch = 0 : i64, scratch_operands = 0 : i64, tpu.core_type = #tpu.core_type<tc>, window_params = [{transform_indices = @transform_0, window_bounds = array<i64: 1, 8, 256>}, {pipeline_mode = #tpu.pipeline_mode<synchronous>, transform_indices = @transform_1, window_bounds = array<i64: 9, 8, 256>}, {pipeline_mode = #tpu.pipeline_mode<synchronous>, transform_indices = @transform_2, window_bounds = array<i64: 16, 8>}, {pipeline_mode = #tpu.pipeline_mode<synchronous>, transform_indices = @transform_3, window_bounds = array<i64: 16, 1>}, {transform_indices = @transform_4, window_bounds = array<i64: 1, 16, 256>}]} {
    %c0 = arith.constant 0 : index
    %c0_0 = arith.constant 0 : index
    %c0_1 = arith.constant 0 : index
    %0 = vector.load %arg1[%c0, %c0_0, %c0_1] : memref<1x8x256xf32, #tpu.memory_space<vmem>>, vector<1x8x256xf32>
    %1 = vector.shape_cast %0 : vector<1x8x256xf32> to vector<8x256xf32>
    %cst = arith.constant 0.000000e+00 : f32
    %2 = vector.broadcast %cst : f32 to vector<8x256xf32>
    %c17_i32 = arith.constant 17 : i32
    %3 = tpu.dynamic_rotate %1 by %c17_i32 dim 1 : vector<8x256xf32>, i32 -> vector<8x256xf32>
    %c0_2 = arith.constant 0 : index
    %c0_3 = arith.constant 0 : index
    %c0_4 = arith.constant 0 : index
    %4 = vector.load %arg2[%c0_2, %c0_3, %c0_4] : memref<9x8x256xf32, #tpu.memory_space<vmem>>, vector<1x8x256xf32>
    %5 = vector.shape_cast %4 : vector<1x8x256xf32> to vector<8x256xf32>
    %6 = arith.mulf %5, %3 : vector<8x256xf32>
    %7 = arith.addf %2, %6 : vector<8x256xf32>
    %c16_i32 = arith.constant 16 : i32
    %8 = tpu.dynamic_rotate %1 by %c16_i32 dim 1 : vector<8x256xf32>, i32 -> vector<8x256xf32>
    %c1 = arith.constant 1 : index
    %c0_5 = arith.constant 0 : index
    %c0_6 = arith.constant 0 : index
    %9 = vector.load %arg2[%c1, %c0_5, %c0_6] : memref<9x8x256xf32, #tpu.memory_space<vmem>>, vector<1x8x256xf32>
    %10 = vector.shape_cast %9 : vector<1x8x256xf32> to vector<8x256xf32>
    %11 = arith.mulf %10, %8 : vector<8x256xf32>
    %12 = arith.addf %7, %11 : vector<8x256xf32>
    %c15_i32 = arith.constant 15 : i32
    %13 = tpu.dynamic_rotate %1 by %c15_i32 dim 1 : vector<8x256xf32>, i32 -> vector<8x256xf32>
    %c2 = arith.constant 2 : index
    %c0_7 = arith.constant 0 : index
    %c0_8 = arith.constant 0 : index
    %14 = vector.load %arg2[%c2, %c0_7, %c0_8] : memref<9x8x256xf32, #tpu.memory_space<vmem>>, vector<1x8x256xf32>
    %15 = vector.shape_cast %14 : vector<1x8x256xf32> to vector<8x256xf32>
    %16 = arith.mulf %15, %13 : vector<8x256xf32>
    %17 = arith.addf %12, %16 : vector<8x256xf32>
    %c1_i32 = arith.constant 1 : i32
    %18 = tpu.dynamic_rotate %1 by %c1_i32 dim 1 : vector<8x256xf32>, i32 -> vector<8x256xf32>
    %c3 = arith.constant 3 : index
    %c0_9 = arith.constant 0 : index
    %c0_10 = arith.constant 0 : index
    %19 = vector.load %arg2[%c3, %c0_9, %c0_10] : memref<9x8x256xf32, #tpu.memory_space<vmem>>, vector<1x8x256xf32>
    %20 = vector.shape_cast %19 : vector<1x8x256xf32> to vector<8x256xf32>
    %21 = arith.mulf %20, %18 : vector<8x256xf32>
    %22 = arith.addf %17, %21 : vector<8x256xf32>
    %c4 = arith.constant 4 : index
    %c0_11 = arith.constant 0 : index
    %c0_12 = arith.constant 0 : index
    %23 = vector.load %arg2[%c4, %c0_11, %c0_12] : memref<9x8x256xf32, #tpu.memory_space<vmem>>, vector<1x8x256xf32>
    %24 = vector.shape_cast %23 : vector<1x8x256xf32> to vector<8x256xf32>
    %25 = arith.mulf %24, %1 : vector<8x256xf32>
    %26 = arith.addf %22, %25 : vector<8x256xf32>
    %c255_i32 = arith.constant 255 : i32
    %27 = tpu.dynamic_rotate %1 by %c255_i32 dim 1 : vector<8x256xf32>, i32 -> vector<8x256xf32>
    %c5 = arith.constant 5 : index
    %c0_13 = arith.constant 0 : index
    %c0_14 = arith.constant 0 : index
    %28 = vector.load %arg2[%c5, %c0_13, %c0_14] : memref<9x8x256xf32, #tpu.memory_space<vmem>>, vector<1x8x256xf32>
    %29 = vector.shape_cast %28 : vector<1x8x256xf32> to vector<8x256xf32>
    %30 = arith.mulf %29, %27 : vector<8x256xf32>
    %31 = arith.addf %26, %30 : vector<8x256xf32>
    %c241_i32 = arith.constant 241 : i32
    %32 = tpu.dynamic_rotate %1 by %c241_i32 dim 1 : vector<8x256xf32>, i32 -> vector<8x256xf32>
    %c6 = arith.constant 6 : index
    %c0_15 = arith.constant 0 : index
    %c0_16 = arith.constant 0 : index
    %33 = vector.load %arg2[%c6, %c0_15, %c0_16] : memref<9x8x256xf32, #tpu.memory_space<vmem>>, vector<1x8x256xf32>
    %34 = vector.shape_cast %33 : vector<1x8x256xf32> to vector<8x256xf32>
    %35 = arith.mulf %34, %32 : vector<8x256xf32>
    %36 = arith.addf %31, %35 : vector<8x256xf32>
    %c240_i32 = arith.constant 240 : i32
    %37 = tpu.dynamic_rotate %1 by %c240_i32 dim 1 : vector<8x256xf32>, i32 -> vector<8x256xf32>
    %c7 = arith.constant 7 : index
    %c0_17 = arith.constant 0 : index
    %c0_18 = arith.constant 0 : index
    %38 = vector.load %arg2[%c7, %c0_17, %c0_18] : memref<9x8x256xf32, #tpu.memory_space<vmem>>, vector<1x8x256xf32>
    %39 = vector.shape_cast %38 : vector<1x8x256xf32> to vector<8x256xf32>
    %40 = arith.mulf %39, %37 : vector<8x256xf32>
    %41 = arith.addf %36, %40 : vector<8x256xf32>
    %c239_i32 = arith.constant 239 : i32
    %42 = tpu.dynamic_rotate %1 by %c239_i32 dim 1 : vector<8x256xf32>, i32 -> vector<8x256xf32>
    %c8 = arith.constant 8 : index
    %c0_19 = arith.constant 0 : index
    %c0_20 = arith.constant 0 : index
    %43 = vector.load %arg2[%c8, %c0_19, %c0_20] : memref<9x8x256xf32, #tpu.memory_space<vmem>>, vector<1x8x256xf32>
    %44 = vector.shape_cast %43 : vector<1x8x256xf32> to vector<8x256xf32>
    %45 = arith.mulf %44, %42 : vector<8x256xf32>
    %46 = arith.addf %41, %45 : vector<8x256xf32>
    %c0_21 = arith.constant 0 : index
    %c0_22 = arith.constant 0 : index
    %47 = vector.load %arg3[%c0_21, %c0_22] : memref<16x8xf32, #tpu.memory_space<vmem>>, vector<16x8xf32>
    %cst_23 = arith.constant dense<0.000000e+00> : vector<16x256xf32>
    %48 = tpu.matmul %47, %46, %cst_23 {dimension_numbers = #tpu.dot_dimension_numbers<[1], [0], [0], [1], [0, 0, 1, 1], [], []>} : vector<16x8xf32>, vector<8x256xf32>, vector<16x256xf32> -> vector<16x256xf32>
    %c0_24 = arith.constant 0 : index
    %c0_25 = arith.constant 0 : index
    %49 = vector.load %arg4[%c0_24, %c0_25] : memref<16x1xf32, #tpu.memory_space<vmem>>, vector<16x1xf32>
    %50 = vector.broadcast %49 : vector<16x1xf32> to vector<16x256xf32>
    %51 = arith.addf %48, %50 : vector<16x256xf32>
    %c0_26 = arith.constant 0 : index
    %c0_27 = arith.constant 0 : index
    %c0_28 = arith.constant 0 : index
    %52 = vector.load %arg5[%c0_26, %c0_27, %c0_28] : memref<1x16x256xf32, #tpu.memory_space<vmem>>, vector<1x16x256xf32>
    %53 = vector.shape_cast %52 : vector<1x16x256xf32> to vector<16x256xf32>
    %54 = vector.shape_cast %51 : vector<16x256xf32> to vector<1x16x256xf32>
    tpu.vector_store %arg5[%c0_26, %c0_27, %c0_28], %54 {strides = array<i32>} : memref<1x16x256xf32, #tpu.memory_space<vmem>>, vector<1x16x256xf32>,
    return
  }
  func.func @transform_0(%arg0: i32) -> (i32, i32, i32) {
    %c0_i32 = arith.constant 0 : i32
    %c0_i32_0 = arith.constant 0 : i32
    %c0_i32_1 = arith.constant 0 : i32
    return %arg0, %c0_i32, %c0_i32_0 : i32, i32, i32
  }
  func.func @transform_1(%arg0: i32) -> (i32, i32, i32) {
    %c0_i32 = arith.constant 0 : i32
    %c0_i32_0 = arith.constant 0 : i32
    %c0_i32_1 = arith.constant 0 : i32
    %c0_i32_2 = arith.constant 0 : i32
    return %c0_i32, %c0_i32_0, %c0_i32_1 : i32, i32, i32
  }
  func.func @transform_2(%arg0: i32) -> (i32, i32) {
    %c0_i32 = arith.constant 0 : i32
    %c0_i32_0 = arith.constant 0 : i32
    %c0_i32_1 = arith.constant 0 : i32
    return %c0_i32, %c0_i32_0 : i32, i32
  }
  func.func @transform_3(%arg0: i32) -> (i32, i32) {
    %c0_i32 = arith.constant 0 : i32
    %c0_i32_0 = arith.constant 0 : i32
    %c0_i32_1 = arith.constant 0 : i32
    return %c0_i32, %c0_i32_0 : i32, i32
  }
  func.func @transform_4(%arg0: i32) -> (i32, i32, i32) {
    %c0_i32 = arith.constant 0 : i32
    %c0_i32_0 = arith.constant 0 : i32
    %c0_i32_1 = arith.constant 0 : i32
    return %arg0, %c0_i32, %c0_i32_0 : i32, i32, i32
  }
}

</mosaic_0001>

<bundles_post_ra>
// kernel: tpu_custom_call.1
= control target key start
LH: loop header
LB: loop body
LE: loop exit
PB: predicated region body
PF: predicated region fallthrough
CT: control target
= control target key end

     0   :  { %9 = vsyncpa [#allocation3], 0  ;;  %s424_s0 = inlined_call_operand.vmem [shape: f32[1,8,256], index: 0, kind: input, shape index: {}]   ;;  %s425_s1 = inlined_call_operand.hbm [shape: f32[9,8,256], index: 1, kind: input, shape index: {}]   ;;  %s426_s2 = inlined_call_operand.vmem [shape: f32[16,8], index: 2, kind: input, shape index: {}]   ;;  %s427_s3 = inlined_call_operand.vmem [shape: f32[16,1], index: 3, kind: input, shape index: {}]   ;;  %s428_s4 = inlined_call_operand.hbm [shape: f32[1,16,256], index: 4, kind: output, shape index: {}]  }
   0x1   :  { %10 = vsyncpa [#allocation4], 0  ;;  %s17_s17 = sshll.u32 %s425_s1, 4  ;;  %s319_s18 = smov [#allocation2]   ;;  %s18_s17 = int_to_ptr.hbm [resolvable:$true] %s17_s17 }
   0x2   :  { %s19_s19 = sshll.u32 %s319_s18, 4  ;;  %s320_s20 = smov 256   ;;  %s20_s19 = int_to_ptr.vmem [resolvable:$true] %s19_s19 }
   0x3   :  { %s321_s21 = smov 16  }
   0x4   :  { %25 = dma.hbm_to_vmem [thread:$0]  %s18_s17, 2304, %s20_s19, [#allocation3], %s320_s20, %s320_s20, %s321_s21  }
   0x5   :  { %315 = dma.done.wait [#allocation3], 2304  }
   0x6   :  { %316 = vsyncadd [#allocation3], 4294964992  ;;  %v365_v0 = vld [vmem:[%s424_s0] sm:$0xff]  ;;  %s322_s1 = smov 17   ;;  %s323_s24 = smov 15   ;;  %v374_v1 = vld [vmem:[%s424_s0 + $0x8] sm:$0xff]  ;;  %v40_v5 = vlaneseq }
   0x7   :  { %51 = vrot.lane.b32.xlu1 %v365_v0, %s321_s21  ;;  %36 = vrot.lane.b32.xlu0 %v365_v0, %s322_s1  ;;  %s324_s27 = smov 1   ;;  %s325_s28 = smov 127   ;;  %v59_v10 = vld [vmem:[#allocation2 + $0x10] sm:$0xff]  ;;  %v60_v11 = vld [vmem:[#allocation2 + $0x18] sm:$0xff]  ;;  %v45_v13 = vld [vmem:[#allocation2] sm:$0xff]  ;;  %v329_v22 = vmov 0  }
   0x8   :  { %65 = vrot.lane.b32.xlu2 %v365_v0, %s323_s24  ;;  %s326_s29 = smov 113   ;;  %s327_s0 = smov 112   ;;  %v390_v8 = vand.u32 127, %v40_v5  ;;  %v46_v17 = vld [vmem:[#allocation2 + $0x8] sm:$0xff]  ;;  %v158_v20 = vld [vmem:[%s427_s3] sm:$0xff]  ;;  %264 = vset.pattern.permute.xlu1 %v329_v22  ;;  %v87_v32 = vld [vmem:[#allocation2 + $0x30] sm:$0xff] }
   0x9   :  { %s328_s30 = smov 111   ;;  %v159_v21 = vld [vmem:[%s427_s3 + $0x8] sm:$0xff]  ;;  %265 = vset.pattern.permute.xlu2 %v329_v22  ;;  %266 = vset.pattern.permute.xlu0 %v329_v22  ;;  %v73_v28 = vld [vmem:[#allocation2 + $0x20] sm:$0xff]  ;;  %v88_v33 = vld [vmem:[#allocation2 + $0x38] sm:$0xff]  ;;  %vm170_vm8 = vcmask 64512   ;;  %s330_s12 = smov [#allocation5]  }
   0xa   :  { %vm55_vm0 = vcmp.lt.s32.totalorder %v390_v8, 16  ;;  %vm42_vm1 = vcmp.lt.s32.totalorder %v390_v8, 17  ;;  %vm69_vm2 = vcmp.lt.s32.totalorder %v390_v8, 15  ;;  %vm83_vm3 = vcmp.lt.s32.totalorder %v390_v8, 1  ;;  %v74_v30 = vld [vmem:[#allocation2 + $0x28] sm:$0xff]  ;;  %v94_v45 = vld [vmem:[#allocation2 + $0x40] sm:$0xff] }
   0xb   :  { %v95_v44 = vld [vmem:[#allocation2 + $0x48] sm:$0xff]  ;;  %vm104_vm4 = vcmp.lt.s32.totalorder %v390_v8, 127  ;;  %v108_v49 = vld [vmem:[#allocation2 + $0x50] sm:$0xff]  ;;  %v109_v50 = vld [vmem:[#allocation2 + $0x58] sm:$0xff]  ;;  %v96_v55 = vmul.f32 %v94_v45, %v365_v0  ;;  %vm118_vm5 = vcmp.lt.s32.totalorder %v390_v8, 113  ;;  %vm132_vm6 = vcmp.lt.s32.totalorder %v390_v8, 112 }
   0xc   :  { %v97_v48 = vmul.f32 %v95_v44, %v374_v1  ;;  %v122_v61 = vld [vmem:[#allocation2 + $0x60] sm:$0xff]  ;;  %v123_v62 = vld [vmem:[#allocation2 + $0x68] sm:$0xff]  ;;  %v137_v5 = vld [vmem:[#allocation2 + $0x78] sm:$0xff]  ;;  %vm146_vm7 = vcmp.lt.s32.totalorder %v390_v8, 111  ;;  %s231_s13 = sshll.u32 %s330_s12, 4  ;;  %s232_s13 = int_to_ptr.vmem [resolvable:$true] %s231_s13 }
   0xd   :  { %v156_v8 = vld [vmem:[%s426_s2] sm:$0xff] }
   0xf   :  { %53 = vrot.lane.b32.xlu1 %v374_v1, %s321_s21  ;;  %38 = vrot.lane.b32.xlu0 %v374_v1, %s322_s1 }
  0x10   :  { %67 = vrot.lane.b32.xlu2 %v374_v1, %s323_s24 }
  0x17   :  { %81 = vrot.lane.b32.xlu1 %v374_v1, %s324_s27  ;;  %79 = vrot.lane.b32.xlu0 %v365_v0, %s324_s27 }
  0x18   :  { %100 = vrot.lane.b32.xlu2 %v365_v0, %s325_s28 }
  0x1f   :  { %114 = vrot.lane.b32.xlu1 %v365_v0, %s326_s29  ;;  %102 = vrot.lane.b32.xlu0 %v374_v1, %s325_s28 }
  0x20   :  { %116 = vrot.lane.b32.xlu2 %v374_v1, %s326_s29 }
  0x27   :  { %130 = vrot.lane.b32.xlu1 %v374_v1, %s327_s0  ;;  %128 = vrot.lane.b32.xlu0 %v365_v0, %s327_s0 }
  0x28   :  { %142 = vrot.lane.b32.xlu2 %v365_v0, %s328_s30 }
  0x2f   :  { %144 = vrot.lane.b32.xlu0 %v374_v1, %s328_s30  ;;  %162 = vperm.xlu1 %264, %v158_v20  }
  0x30   :  { %167 = vperm.xlu2 %265, %v159_v21  }
  0x62   :  { %v66_v4 = vpop.permute.xlu2 %65 }
  0x6a   :  { %v68_v9 = vpop.permute.xlu2 %67 }
  0x6b   :  { %v71_v29 = vsel %vm69_vm2, %v68_v9, %v66_v4  ;;  %v70_v31 = vsel %vm69_vm2, %v66_v4, %v68_v9  ;;  %v136_v4 = vld [vmem:[#allocation2 + $0x70] sm:$0xff] }
  0x6c   :  { %v75_v40 = vmul.f32 %v73_v28, %v71_v29  ;;  %v76_v41 = vmul.f32 %v74_v30, %v70_v31  ;;  %v157_v28 = vld [vmem:[%s426_s2 + $0x8] sm:$0xff]  ;;  %s233_s2 = sshll.u32 %s428_s4, 4  ;;  %s234_s2 = int_to_ptr.hbm [resolvable:$true] %s233_s2 }
  0x72   :  { %v101_v27 = vpop.permute.xlu2 %100 }
  0x79   :  { %v52_v2 = vpop.permute.xlu1 %51  ;;  %v37_v3 = vpop.permute.xlu0 %36 }
  0x7a   :  { %v117_v56 = vpop.permute.xlu2 %116 }
  0x81   :  { %v54_v6 = vpop.permute.xlu1 %53  ;;  %v39_v7 = vpop.permute.xlu0 %38 }
  0x82   :  { %v56_v12 = vsel %vm55_vm0, %v52_v2, %v54_v6  ;;  %v57_v16 = vsel %vm55_vm0, %v54_v6, %v52_v2  ;;  %v43_v18 = vsel %vm42_vm1, %v37_v3, %v39_v7  ;;  %v44_v19 = vsel %vm42_vm1, %v39_v7, %v37_v3 }
  0x83   :  { %v61_v23 = vmul.f32 %v59_v10, %v57_v16  ;;  %v62_v24 = vmul.f32 %v60_v11, %v56_v12  ;;  %v47_v25 = vmul.f32 %v45_v13, %v44_v19  ;;  %v48_v26 = vmul.f32 %v46_v17, %v43_v18  ;;  %v151_v16 = vld [vmem:[#allocation2 + $0x88] sm:$0xff] }
  0x85   :  { %v63_v36 = vadd.f32 %v61_v23, %v47_v25  ;;  %v64_v37 = vadd.f32 %v62_v24, %v48_v26 }
  0x87   :  { %v77_v46 = vadd.f32 %v75_v40, %v63_v36  ;;  %v78_v47 = vadd.f32 %v76_v41, %v64_v37 }
  0x89   :  { %v82_v14 = vpop.permute.xlu1 %81  ;;  %v80_v15 = vpop.permute.xlu0 %79 }
  0x8a   :  { %v84_v34 = vsel %vm83_vm3, %v80_v15, %v82_v14  ;;  %v85_v35 = vsel %vm83_vm3, %v82_v14, %v80_v15  ;;  %v143_v14 = vpop.permute.xlu2 %142  ;;  %v150_v15 = vld [vmem:[#allocation2 + $0x80] sm:$0xff] }
  0x8b   :  { %v89_v42 = vmul.f32 %v87_v32, %v85_v35  ;;  %v90_v43 = vmul.f32 %v88_v33, %v84_v34 }
  0x8d   :  { %v91_v53 = vadd.f32 %v89_v42, %v77_v46  ;;  %v92_v54 = vadd.f32 %v90_v43, %v78_v47 }
  0x8f   :  { %v99_v2 = vadd.f32 %v97_v48, %v92_v54  ;;  %v98_v3 = vadd.f32 %v96_v55, %v91_v53 }
  0x91   :  { %v115_v38 = vpop.permute.xlu1 %114  ;;  %v103_v39 = vpop.permute.xlu0 %102 }
  0x92   :  { %v105_v51 = vsel %vm104_vm4, %v101_v27, %v103_v39  ;;  %v106_v52 = vsel %vm104_vm4, %v103_v39, %v101_v27  ;;  %v119_v63 = vsel %vm118_vm5, %v115_v38, %v117_v56  ;;  %v120_v1 = vsel %vm118_vm5, %v117_v56, %v115_v38  ;;  %v168_v34 = vpop.permute.xlu2 %167 }
  0x93   :  { %v110_v57 = vmul.f32 %v108_v49, %v105_v51  ;;  %v111_v58 = vmul.f32 %v109_v50, %v106_v52  ;;  %v124_v10 = vmul.f32 %v122_v61, %v119_v63  ;;  %v125_v11 = vmul.f32 %v123_v62, %v120_v1 }
  0x95   :  { %v112_v0 = vadd.f32 %v110_v57, %v98_v3  ;;  %v113_v9 = vadd.f32 %v111_v58, %v99_v2 }
  0x97   :  { %v126_v17 = vadd.f32 %v124_v10, %v112_v0  ;;  %v127_v18 = vadd.f32 %v125_v11, %v113_v9 }
  0x99   :  { %v131_v59 = vpop.permute.xlu1 %130  ;;  %v129_v60 = vpop.permute.xlu0 %128 }
  0x9a   :  { %v133_v6 = vsel %vm132_vm6, %v129_v60, %v131_v59  ;;  %v134_v7 = vsel %vm132_vm6, %v131_v59, %v129_v60 }
  0x9b   :  { %v138_v12 = vmul.f32 %v136_v4, %v133_v6  ;;  %v139_v13 = vmul.f32 %v137_v5, %v134_v7 }
  0x9d   :  { %v140_v24 = vadd.f32 %v138_v12, %v126_v17  ;;  %v141_v25 = vadd.f32 %v139_v13, %v127_v18 }
  0xa1   :  { %v145_v19 = vpop.permute.xlu0 %144  ;;  %v163_v29 = vpop.permute.xlu1 %162 }
  0xa2   :  { %v147_v20 = vsel %vm146_vm7, %v143_v14, %v145_v19  ;;  %v148_v21 = vsel %vm146_vm7, %v145_v19, %v143_v14 }
  0xa3   :  { %v152_v22 = vmul.f32 %v150_v15, %v147_v20  ;;  %v153_v23 = vmul.f32 %v151_v16, %v148_v21 }
  0xa5   :  { %v154_v26 = vadd.f32 %v152_v22, %v140_v24  ;;  %v155_v27 = vadd.f32 %v153_v23, %v141_v25 }
  0xa7   :  { %192 = vmatpush.msra.mxu0 %v154_v26  ;;  %250 = vmatpush.msra.mxu2 %v154_v26 }
  0xa8   :  { %215 = vmatpush.msra.mxu1 %v155_v27  ;;  %251 = vmatpush.msra.mxu3 %v155_v27 }
  0xa9   :  { %247 = vmatmul.msk.f32.vlgmr.msra.gmra.mxu2 %vm170_vm8, %v157_v28  ;;  %249 = vmatmul.msk.f32.vlgmr.msra.gmra.mxu3 %vm170_vm8, %v157_v28 }
  0xaa   :  { %246 = vmatmul.msk.f32.vlgmr.msra.gmra.mxu0 %vm170_vm8, %v156_v8  ;;  %248 = vmatmul.msk.f32.vlgmr.msra.gmra.mxu1 %vm170_vm8, %v156_v8 }
 0x127   :  { %v194_v30 = vpop.f32.mrf.mxu0  ;;  %v217_v31 = vpop.f32.mrf.mxu1 }
 0x128   :  { %v195_v32 = vadd.f32 %v194_v30, %v163_v29  ;;  %v218_v33 = vadd.f32 %v217_v31, %v163_v29 }
 0x12a   :  { %223 = vst [vmem:[#allocation5] sm:$0xff] %v195_v32 }
 0x12b   :  { %224 = vst [vmem:[#allocation5 + $0x8] sm:$0xff] %v218_v33 }
 0x12c   :  { %v197_v35 = vpop.f32.mrf.mxu2  ;;  %v220_v36 = vpop.f32.mrf.mxu3 }
 0x12d   :  { %v198_v37 = vadd.f32 %v197_v35, %v168_v34  ;;  %v221_v38 = vadd.f32 %v220_v36, %v168_v34 }
 0x12f   :  { %225 = vst [vmem:[#allocation5 + $0x10] sm:$0xff] %v198_v37 }
 0x130   :  { %226 = vst [vmem:[#allocation5 + $0x18] sm:$0xff] %v221_v38 }
 0x131   :  { %239 = dma.vmem_to_hbm [thread:$0]  %s232_s13, 512, %s234_s2, [#allocation4], %s320_s20, %s320_s20, %s321_s21  }
 0x132   :  { %317 = dma.done.wait [#allocation4], 512  }
 0x133   :  { %318 = vsyncadd [#allocation4], 4294966784 }
 0x134   :  { %244 = vsyncpa [#allocation3], 1 }
 0x135   :  { %245 = vsyncpa [#allocation4], 1 }

</bundles_post_ra>
